<compile_context>
chip_gen: v6e
topology: v6e:2x2x1
jax: 0.10.0
libtpu: 0.0.40
codegen_flags: <defaults>
</compile_context>

<pallas_src>
import functools

import jax
import jax.numpy as jnp
from jax.experimental import pallas as pl
from jax.experimental.pallas import tpu as pltpu


def _window_sum_log(xpad, K, L):
    """Sliding-window sum of width K over xpad (Lp, TC) -> (L, TC), O(log K) adds."""
    result = None
    offset = 0
    w = 1
    cur = xpad  # cur[i] = sum of xpad[i : i + w]
    rem = K
    while rem:
        if rem & 1:
            seg = cur[offset:offset + L, :]
            result = seg if result is None else result + seg
            offset += w
        rem >>= 1
        if rem:
            n = cur.shape[0]
            cur = cur[0:n - w, :] + cur[w:n, :]   # width doubles to 2w
            w *= 2
    return result


def _decomp_kernel(x_ref, res_ref, mean_ref, *, K, L, FRONT):
    """x_ref/res_ref/mean_ref: (L, TC) blocks (batch dim squeezed)."""
    TC = x_ref.shape[-1]
    END = K - 1 - FRONT

    # Single load of the input block; accumulate in f32.
    x = x_ref[...].astype(jnp.float32)

    # In-kernel replicate padding (never touches HBM).
    parts = []
    if FRONT > 0:  # static Python ints -> resolved at trace time
        parts.append(jnp.broadcast_to(x[0:1, :], (FRONT, TC)))
    parts.append(x)
    if END > 0:
        parts.append(jnp.broadcast_to(x[L - 1:L, :], (END, TC)))
    xpad = jnp.concatenate(parts, axis=0) if len(parts) > 1 else x

    if K <= 8:
        # Simple unrolled window sum; the k == FRONT term is exactly x (already
        # in registers), so skip re-slicing it.
        acc = x
        for k in range(K):
            if k == FRONT:
                continue
            acc = acc + xpad[k:k + L, :]
        win = acc
    else:
        # Log-depth doubling: O(log K) adds instead of K-1.
        win = _window_sum_log(xpad, K, L)

    mean = win * (1.0 / K)
    mean_ref[...] = mean.astype(mean_ref.dtype)
    res_ref[...] = (x - mean).astype(res_ref.dtype)


def series_decomp(x, kernel_size):
    """x: (B, L, C). Returns (res, moving_mean), both (B, L, C)."""
    B, L, C = x.shape
    K = int(kernel_size)
    end_pad = (K - 1) // 2               # matches math.floor((K-1)//2)
    front_pad = K - 1 - end_pad
    Lp = L + K - 1
    itemsize = jnp.dtype(x.dtype).itemsize

    # Channel tile: largest 128-multiple divisor of C whose block stays ~<=4 MiB,
    # otherwise the full C extent (required when C is not a multiple of 128).
    TC = C
    for cand in (512, 256, 128):
        if C % cand == 0 and L * cand * 4 <= (4 << 20):
            TC = cand
            break
    n_ct = C // TC

    # VMEM budget: double-buffered input + 2 outputs, plus f32 working set for
    # the padded value and a few intermediates.
    block_bytes = 3 * (L * TC * itemsize)          # in + 2 outs, one buffer each
    work_bytes = 4 * (Lp * TC * 4)                 # padded value + temporaries
    vmem_need = 2 * block_bytes + work_bytes
    vmem_limit = int(min(48 * 1024 * 1024,
                         max(32 * 1024 * 1024, 2 * vmem_need + (4 << 20))))

    cost = pl.CostEstimate(
        flops=(K + 2) * B * L * C,
        transcendentals=0,
        bytes_accessed=3 * B * L * C * itemsize,
    )

    kernel = functools.partial(_decomp_kernel, K=K, L=L, FRONT=front_pad)

    # None == pl.Squeezed(): the size-1 batch dim is squeezed out of the refs.
    blk = (None, L, TC)
    idx = lambda b, c: (b, 0, c)

    res, mean = pl.pallas_call(
        kernel,
        out_shape=(
            jax.ShapeDtypeStruct((B, L, C), x.dtype),
            jax.ShapeDtypeStruct((B, L, C), x.dtype),
        ),
        grid_spec=pltpu.PrefetchScalarGridSpec(
            num_scalar_prefetch=0,
            grid=(B, n_ct),
            in_specs=[pl.BlockSpec(blk, idx)],
            out_specs=[pl.BlockSpec(blk, idx), pl.BlockSpec(blk, idx)],
        ),
        compiler_params=pltpu.CompilerParams(
            dimension_semantics=("parallel", "parallel"),
            vmem_limit_bytes=vmem_limit,
        ),
        cost_estimate=cost,
    )(x)
    return res, mean


def _reference(x, kernel_size):
    # Pure-JAX reference mirroring the PyTorch module exactly.
    K = int(kernel_size)
    end_pad = (K - 1) // 2
    front_pad = K - 1 - end_pad
    front = jnp.repeat(x[:, 0:1, :], front_pad, axis=1)
    end = jnp.repeat(x[:, -1:, :], end_pad, axis=1)
    xp = jnp.concatenate([front, x, end], axis=1)
    L = x.shape[1]
    mean = sum(xp[:, k:k + L, :] for k in range(K)) / K
    return x - mean, mean


if __name__ == "__main__":
    key = jax.random.PRNGKey(0)

    # Primary check: small shapes consistent with the module's forward.
    B, L, C = 2, 16, 8
    x = jax.random.normal(key, (B, L, C), dtype=jnp.float32)

    res, mean = series_decomp(x, 5)
    jax.block_until_ready((res, mean))
    res_r, mean_r = _reference(x, 5)
    assert res.shape == (B, L, C) and mean.shape == (B, L, C)
    assert jnp.allclose(res, res_r, atol=1e-5), "res mismatch (K=5)"
    assert jnp.allclose(mean, mean_r, atol=1e-5), "mean mismatch (K=5)"

    # Even kernel_size (asymmetric replicate pad, matches this module's formula).
    res2, mean2 = series_decomp(x, 4)
    jax.block_until_ready((res2, mean2))
    res2_r, mean2_r = _reference(x, 4)
    assert jnp.allclose(res2, res2_r, atol=1e-5), "res mismatch (K=4)"
    assert jnp.allclose(mean2, mean2_r, atol=1e-5), "mean mismatch (K=4)"

    # Lane-dense channel-tile path (C multiple of 128).
    x3 = jax.random.normal(jax.random.PRNGKey(1), (1, 24, 128), dtype=jnp.float32)
    res3, mean3 = series_decomp(x3, 7)
    jax.block_until_ready((res3, mean3))
    res3_r, mean3_r = _reference(x3, 7)
    assert jnp.allclose(res3, res3_r, atol=1e-5), "res mismatch (C=128)"
    assert jnp.allclose(mean3, mean3_r, atol=1e-5), "mean mismatch (C=128)"

    # Large kernel_size exercises the log-depth window-sum path.
    x4 = jax.random.normal(jax.random.PRNGKey(2), (2, 40, 8), dtype=jnp.float32)
    res4, mean4 = series_decomp(x4, 25)
    jax.block_until_ready((res4, mean4))
    res4_r, mean4_r = _reference(x4, 25)
    assert jnp.allclose(res4, res4_r, atol=1e-5), "res mismatch (K=25)"
    assert jnp.allclose(mean4, mean4_r, atol=1e-5), "mean mismatch (K=25)"

    print("KERNEL_OK")
</pallas_src>

<mosaic_0001>
module attributes {stable_mosaic.version = 11 : i64} {
  func.func @_decomp_kernel(%arg0: i32, %arg1: i32, %arg2: memref<1x16x8xf32, #tpu.memory_space<vmem>>, %arg3: memref<1x16x8xf32, #tpu.memory_space<vmem>>, %arg4: memref<1x16x8xf32, #tpu.memory_space<vmem>>) attributes {dimension_semantics = [#tpu.dimension_semantics<parallel>, #tpu.dimension_semantics<parallel>], iteration_bounds = array<i64: 2, 1>, scalar_prefetch = 0 : i64, scratch_operands = 0 : i64, tpu.core_type = #tpu.core_type<tc>, window_params = [{transform_indices = @transform_0, window_bounds = array<i64: 1, 16, 8>}, {transform_indices = @transform_1, window_bounds = array<i64: 1, 16, 8>}, {transform_indices = @transform_2, window_bounds = array<i64: 1, 16, 8>}]} {
    %c0 = arith.constant 0 : index
    %c0_0 = arith.constant 0 : index
    %c0_1 = arith.constant 0 : index
    %0 = vector.load %arg2[%c0, %c0_0, %c0_1] : memref<1x16x8xf32, #tpu.memory_space<vmem>>, vector<1x16x8xf32>
    %1 = vector.shape_cast %0 : vector<1x16x8xf32> to vector<16x8xf32>
    %2 = vector.extract_strided_slice %1 {offsets = [0, 0], sizes = [1, 8], strides = [1, 1]} : vector<16x8xf32> to vector<1x8xf32>
    %3 = vector.shape_cast %2 : vector<1x8xf32> to vector<1x8xf32>
    %4 = vector.broadcast %3 : vector<1x8xf32> to vector<2x8xf32>
    %5 = vector.extract_strided_slice %1 {offsets = [15, 0], sizes = [1, 8], strides = [1, 1]} : vector<16x8xf32> to vector<1x8xf32>
    %6 = vector.shape_cast %5 : vector<1x8xf32> to vector<1x8xf32>
    %7 = vector.broadcast %6 : vector<1x8xf32> to vector<2x8xf32>
    %8 = tpu.concatenate %4, %1, %7 in 0 : vector<2x8xf32>, vector<16x8xf32>, vector<2x8xf32> -> vector<20x8xf32>
    %9 = vector.extract_strided_slice %8 {offsets = [0, 0], sizes = [16, 8], strides = [1, 1]} : vector<20x8xf32> to vector<16x8xf32>
    %10 = arith.addf %1, %9 : vector<16x8xf32>
    %11 = vector.extract_strided_slice %8 {offsets = [1, 0], sizes = [16, 8], strides = [1, 1]} : vector<20x8xf32> to vector<16x8xf32>
    %12 = arith.addf %10, %11 : vector<16x8xf32>
    %13 = vector.extract_strided_slice %8 {offsets = [3, 0], sizes = [16, 8], strides = [1, 1]} : vector<20x8xf32> to vector<16x8xf32>
    %14 = arith.addf %12, %13 : vector<16x8xf32>
    %15 = vector.extract_strided_slice %8 {offsets = [4, 0], sizes = [16, 8], strides = [1, 1]} : vector<20x8xf32> to vector<16x8xf32>
    %16 = arith.addf %14, %15 : vector<16x8xf32>
    %cst = arith.constant 2.000000e-01 : f32
    %17 = vector.broadcast %cst : f32 to vector<16x8xf32>
    %18 = arith.mulf %16, %17 : vector<16x8xf32>
    %c0_2 = arith.constant 0 : index
    %c0_3 = arith.constant 0 : index
    %c0_4 = arith.constant 0 : index
    %19 = vector.load %arg4[%c0_2, %c0_3, %c0_4] : memref<1x16x8xf32, #tpu.memory_space<vmem>>, vector<1x16x8xf32>
    %20 = vector.shape_cast %19 : vector<1x16x8xf32> to vector<16x8xf32>
    %21 = vector.shape_cast %18 : vector<16x8xf32> to vector<1x16x8xf32>
    tpu.vector_store %arg4[%c0_2, %c0_3, %c0_4], %21 {strides = array<i32>} : memref<1x16x8xf32, #tpu.memory_space<vmem>>, vector<1x16x8xf32>,
    %22 = arith.subf %1, %18 : vector<16x8xf32>
    %c0_5 = arith.constant 0 : index
    %c0_6 = arith.constant 0 : index
    %c0_7 = arith.constant 0 : index
    %23 = vector.load %arg3[%c0_5, %c0_6, %c0_7] : memref<1x16x8xf32, #tpu.memory_space<vmem>>, vector<1x16x8xf32>
    %24 = vector.shape_cast %23 : vector<1x16x8xf32> to vector<16x8xf32>
    %25 = vector.shape_cast %22 : vector<16x8xf32> to vector<1x16x8xf32>
    tpu.vector_store %arg3[%c0_5, %c0_6, %c0_7], %25 {strides = array<i32>} : memref<1x16x8xf32, #tpu.memory_space<vmem>>, vector<1x16x8xf32>,
    return
  }
  func.func @transform_0(%arg0: i32, %arg1: i32) -> (i32, i32, i32) {
    %c0_i32 = arith.constant 0 : i32
    %c0_i32_0 = arith.constant 0 : i32
    return %arg0, %c0_i32, %arg1 : i32, i32, i32
  }
  func.func @transform_1(%arg0: i32, %arg1: i32) -> (i32, i32, i32) {
    %c0_i32 = arith.constant 0 : i32
    %c0_i32_0 = arith.constant 0 : i32
    return %arg0, %c0_i32, %arg1 : i32, i32, i32
  }
  func.func @transform_2(%arg0: i32, %arg1: i32) -> (i32, i32, i32) {
    %c0_i32 = arith.constant 0 : i32
    %c0_i32_0 = arith.constant 0 : i32
    return %arg0, %c0_i32, %arg1 : i32, i32, i32
  }
}

</mosaic_0001>

<bundles_post_ra>
// kernel: tpu_custom_call.1
= control target key start
LH: loop header
LB: loop body
LE: loop exit
PB: predicated region body
PF: predicated region fallthrough
CT: control target
= control target key end

     0   :  { %s469_s9 = smov 0   ;;  %s471_s10 = smov 0   ;;  %s516_s0 = inlined_call_operand.vmem [shape: f32[2,16,8], index: 0, kind: input, shape index: {}]   ;;  %s517_s1 = inlined_call_operand.vmem [shape: f32[2,16,8], index: 1, kind: output, shape index: {0}]   ;;  %s518_s2 = inlined_call_operand.vmem [shape: f32[2,16,8], index: 2, kind: output, shape index: {1}]  }
   0x1   :  { %s473_s11 = smov 0  }
   0x2 LB: > { %s25_s12 = sadd.s32 1, %s448_s10  ;;  %p394_p0 = scmp.ge.s32.totalorder %s452_s11, 1  ;;  %s452_s11 = sphi %s473_s11, %s13_s11   ;;  %s448_s10 = sphi %s471_s10, %s520_s10   ;;  %s444_s9 = sphi %s469_s9, %s519_s9  }
   0x3   : > { %p27_p1 = scmp.ge.s32.totalorder %s25_s12, 2  ;;  %p136_p2 = scmp.lt.s32.totalorder %s452_s11, 3 }
   0x5   : > { %s522_s12 = smov (%p27_p1, %s25_s12), 0  ;;  %p137_p3 = pnand %p394_p0, %p136_p2 }
   0x6   : > { %p172_p4 = scmp.lt.s32.totalorder (!%p137_p3), %s444_s9, 1 }
   0x7   : > { %140 = sbr.rel (%p137_p3) target bundleno = 36 (0x24), region = 24 }
   0xc   : > { %v198_v0 = vlaneseq  ;;  %s524_s9 = smov (!%p172_p4, %s444_s9), 1  ;;  %vm208_vm0 = vcmask 1041408   ;;  %vm221_vm1 = vcmask 1046528   ;;  %vm231_vm2 = vcmask 1044480  }
   0xd   : > { %s487_s13 = sshll.u32 %s524_s9, 4  ;;  %vm241_vm3 = vcmask 1043456   ;;  %vm253_vm4 = vcmask 64512  }
   0xe   : > { %v199_v1 = vshrl.u32 %v198_v0, 7  ;;  %s179_s16 = scalar_lea.vmem %s516_s0, %s487_s13  ;;  %s195_s19 = scalar_lea.vmem %s518_s2, %s487_s13 }
   0xf   : > { %v196_v4 = vld [vmem:[%s179_s16] sm:$0xff]  ;;  %v197_v5 = vld [vmem:[%s179_s16 + $0x8] sm:$0xff]  ;;  %s187_s22 = scalar_lea.vmem %s517_s1, %s487_s13 }
  0x10   : > { %v200_v2 = vsub.s32 0, %v199_v1  ;;  %v204_v3 = vsub.s32 7, %v199_v1  ;;  %v209_v8 = vrot.slane %v196_v4, 6  ;;  %v210_v9 = vrot.slane %v197_v5, 6 }
  0x12   : > { %v201_v6 = vrot.slane %v196_v4, %v200_v2  ;;  %v205_v7 = vrot.slane %v197_v5, %v204_v3  ;;  %v211_v10 = vsel %vm208_vm0, %v209_v8, %v210_v9 }
  0x13   : > { %v223_v15 = vrot.slane %v211_v10, 1  ;;  %v233_v17 = vrot.slane %v211_v10, 3  ;;  %v243_v19 = vrot.slane %v211_v10, 4  ;;  %v218_v20 = vadd.f32 %v211_v10, %v197_v5 }
  0x14   : > { %v215_v11 = vsel %vm208_vm0, %v201_v6, %v209_v8  ;;  %v216_v12 = vsel %vm208_vm0, %v210_v9, %v205_v7 }
  0x15   : > { %v217_v13 = vadd.f32 %v215_v11, %v196_v4  ;;  %v222_v14 = vrot.slane %v215_v11, 1  ;;  %v232_v16 = vrot.slane %v215_v11, 3  ;;  %v242_v18 = vrot.slane %v215_v11, 4 }
  0x16   : > { %v225_v22 = vrot.slane %v216_v12, 1  ;;  %v235_v23 = vrot.slane %v216_v12, 3  ;;  %v245_v24 = vrot.slane %v216_v12, 4 }
  0x17   : > { %v224_v21 = vsel %vm221_vm1, %v222_v14, %v223_v15  ;;  %v234_v26 = vsel %vm231_vm2, %v232_v16, %v233_v17  ;;  %v244_v27 = vsel %vm241_vm3, %v242_v18, %v243_v19 }
  0x18   : > { %v229_v25 = vadd.f32 %v224_v21, %v217_v13  ;;  %v226_v28 = vsel %vm221_vm1, %v223_v15, %v225_v22  ;;  %v236_v29 = vsel %vm231_vm2, %v233_v17, %v235_v23  ;;  %v246_v32 = vsel %vm241_vm3, %v243_v19, %v245_v24 }
  0x19   : > { %v230_v31 = vadd.f32 %v226_v28, %v218_v20 }
  0x1a   : > { %v239_v30 = vadd.f32 %v234_v26, %v229_v25 }
  0x1b   : > { %v240_v34 = vadd.f32 %v236_v29, %v230_v31 }
  0x1c   : > { %v249_v33 = vadd.f32 %v244_v27, %v239_v30 }
  0x1d   : > { %v250_v36 = vadd.f32 %v246_v32, %v240_v34 }
  0x1e   : > { %v251_v35 = vmul.f32 0.2, %v249_v33 }
  0x1f   : > { %v252_v37 = vmul.f32 0.2, %v250_v36 }
  0x20   : > { %254 = vst.msk [vmem:[%s195_s19] sm:$0xff] %vm253_vm4, %v251_v35  ;;  %v256_v38 = vsub.f32 %v196_v4, %v251_v35 }
  0x21   : > { %255 = vst.msk [vmem:[%s195_s19 + $0x8] sm:$0xff] %vm253_vm4, %v252_v37  ;;  %v257_v39 = vsub.f32 %v197_v5, %v252_v37 }
  0x22   : > { %258 = vst.msk [vmem:[%s187_s22] sm:$0xff] %vm253_vm4, %v256_v38 }
  0x23   : > { %259 = vst.msk [vmem:[%s187_s22 + $0x8] sm:$0xff] %vm253_vm4, %v257_v39 }
  0x24 PF: > { %s13_s11 = sadd.s32 1, %s452_s11   ;;  %s519_s9 = smov %s448_s10 }
  0x25   : > { %p10_p5 = scmp.ge.s32.totalorder %s13_s11, 4   ;;  %s520_s10 = smov %s522_s12 }
  0x27   :  { %12 = sbr.rel (!%p10_p5) target bundleno = 2 (0x2), region = 66 }

</bundles_post_ra>
